<compile_context>
chip_gen: v7x
topology: tpu7x:2x2x1
jax: 0.10.0
libtpu: 0.0.40
codegen_flags: <defaults>
</compile_context>

<pallas_src>
import jax
import jax.numpy as jnp
from jax.experimental import pallas as pl
from jax.experimental.pallas import tpu as pltpu

LN_EPS = 1e-5  # torch.layer_norm default

_HEAD_BUDGET_FRAC = 0.35   # fraction of VMEM for the multi-buffered head tiles
_VMEM_LIMIT_FRAC = 0.65    # scoped VMEM limit fraction
_FALLBACK_VMEM = 64 << 20  # conservative (v7x-sized) capacity if query fails
_SMALL_VMEM = 64 << 20     # <= this => v7x-class part (deeper pipelining pays)


def _cdiv(a, b):
    return -(-a // b)


def _tpu_vmem_capacity():
    """(capacity_bytes, query_succeeded). Conservative fallback on failure."""
    try:
        return int(pltpu.get_tpu_info().vmem_capacity_bytes), True
    except Exception:
        return _FALLBACK_VMEM, False


def _postprocess_kernel(x_ref, w_ref, b_ref, head_ref, out_ref):
    # x_ref/w_ref/b_ref: (1, D), head_ref: (tv, D), out_ref: (1, tv)
    x = x_ref[...].astype(jnp.float32)
    mean = jnp.mean(x, axis=-1, keepdims=True)
    var = jnp.mean(jnp.square(x - mean), axis=-1, keepdims=True)  # population var (torch LN)
    zz = (x - mean) * jax.lax.rsqrt(var + LN_EPS)
    zz = zz * w_ref[...].astype(jnp.float32) + b_ref[...].astype(jnp.float32)
    # Matvec: contract on D so the (tv, D) tile goes to the MXU as-is
    # (flash-attention q.k^T pattern: no transpose, no tile-sized upcast copy).
    out = jax.lax.dot_general(
        zz.astype(head_ref.dtype), head_ref[...],
        dimension_numbers=(((1,), (1,)), ((), ())),
        preferred_element_type=jnp.float32)
    out_ref[...] = out.astype(out_ref.dtype)


def _choose_tv(V, D, head_itemsize, head_budget_bytes, nbuf):
    """Largest lane-aligned vocab tile whose nbuf-buffered copy fits the budget,
    then (if tiled) balanced so the tile count is even and >= 4 for megacore."""
    tv = head_budget_bytes // (nbuf * D * head_itemsize)
    tv = max(128, (tv // 128) * 128)
    tv = min(tv, 4096)            # diminishing returns past ~1-2K rows
    if tv >= V:
        return V                  # tiny vocab: single block, no grid overhead
    # Balance across (up to 2) TensorCores: take the largest candidate, at most
    # 2x finer, whose tile count is even and >= 4; otherwise keep the max tile.
    cand = tv
    while cand >= max(128, tv // 2):
        n = _cdiv(V, cand)
        if n >= 4 and n % 2 == 0:
            return cand
        cand -= 128
    return tv


def rwkv_postprocess(x, ln_weight, ln_bias, head, state, *, tv=None):
    """x: (D,), ln_weight/ln_bias: (D,), head: (V, D) -> (out (V,) f32, state)."""
    D = x.shape[0]
    V, D2 = head.shape
    assert D2 == D

    head_itemsize = jnp.dtype(head.dtype).itemsize
    capacity, cap_known = _tpu_vmem_capacity()
    head_budget = int(_HEAD_BUDGET_FRAC * capacity)
    vmem_limit = int(_VMEM_LIMIT_FRAC * capacity)
    # Deeper head pipelining only on small-VMEM (v7x-class) parts where it is
    # known to help; keep the default depth-2 path elsewhere.
    nbuf = 3 if (cap_known and capacity <= _SMALL_VMEM) else 2

    if tv is None:
        tv = _choose_tv(V, D, head_itemsize, head_budget, nbuf)
    tv = min(tv, V)
    grid = (_cdiv(V, tv),)        # partial last tile is lane-masked by Pallas

    x2 = x.reshape(1, D)
    w2 = ln_weight.reshape(1, D)
    b2 = ln_bias.reshape(1, D)

    head_spec_kwargs = {}
    if nbuf > 2 and grid[0] > 1:
        head_spec_kwargs["pipeline_mode"] = pl.Buffered(nbuf)
    head_spec = pl.BlockSpec((tv, D), lambda i: (i, 0), **head_spec_kwargs)

    cost = pl.CostEstimate(
        flops=2 * V * D,
        transcendentals=D,  # rsqrt / LN epilogue (negligible, advisory only)
        bytes_accessed=V * D * head_itemsize + V * 4 + 3 * D * 4)

    out = pl.pallas_call(
        _postprocess_kernel,
        out_shape=jax.ShapeDtypeStruct((1, V), jnp.float32),
        grid_spec=pltpu.PrefetchScalarGridSpec(
            num_scalar_prefetch=0,
            grid=grid,
            in_specs=[
                pl.BlockSpec((1, D), lambda i: (0, 0)),    # x
                pl.BlockSpec((1, D), lambda i: (0, 0)),    # ln weight
                pl.BlockSpec((1, D), lambda i: (0, 0)),    # ln bias
                head_spec,                                 # head tile (HBM stream)
            ],
            out_specs=pl.BlockSpec((1, tv), lambda i: (0, i)),  # lane-dense output
        ),
        compiler_params=pltpu.CompilerParams(
            dimension_semantics=("parallel",),
            vmem_limit_bytes=vmem_limit),
        cost_estimate=cost,
    )(x2, w2, b2, head)

    return out.reshape(V), state


def _reference(x, ln_weight, ln_bias, head):
    x = x.astype(jnp.float32)
    mean = jnp.mean(x)
    var = jnp.mean((x - mean) ** 2)
    zz = (x - mean) / jnp.sqrt(var + LN_EPS) * ln_weight.astype(jnp.float32) \
        + ln_bias.astype(jnp.float32)
    return head.astype(jnp.float32) @ zz


if __name__ == "__main__":
    D = 128   # n_embd
    V = 256   # vocab size (small demo)

    key = jax.random.PRNGKey(0)
    k_x, k_w, k_b, k_h, k_s = jax.random.split(key, 5)

    x = jax.random.normal(k_x, (D,), dtype=jnp.float32)
    ln_weight = 1.0 + 0.1 * jax.random.normal(k_w, (D,), dtype=jnp.float32)   # postProcess0
    ln_bias = 0.1 * jax.random.normal(k_b, (D,), dtype=jnp.float32)           # postProcess1
    head = jax.random.normal(k_h, (V, D), dtype=jnp.float32) / jnp.sqrt(D)    # postProcess2
    state = jax.random.normal(k_s, (4, D), dtype=jnp.float32)                 # passthrough

    # 1) small f32 case, auto tile (collapses to a single block)
    out, state_out = rwkv_postprocess(x, ln_weight, ln_bias, head, state)
    out = jax.block_until_ready(out)
    jax.block_until_ready(state_out)
    ref = _reference(x, ln_weight, ln_bias, head)
    assert out.shape == (V,)
    assert jnp.allclose(out, ref, atol=1e-4, rtol=1e-4), "f32 mismatch vs reference"
    assert (state_out == state).all()

    # 2) non-divisible vocab + forced small tile (exercises the cdiv / masked
    #    boundary-tile path used for real vocab sizes like 50277)
    V2 = 320
    head2 = jax.random.normal(jax.random.PRNGKey(1), (V2, D), dtype=jnp.float32) / jnp.sqrt(D)
    out2, _ = rwkv_postprocess(x, ln_weight, ln_bias, head2, state, tv=128)
    out2 = jax.block_until_ready(out2)
    ref2 = _reference(x, ln_weight, ln_bias, head2)
    assert out2.shape == (V2,)
    assert jnp.allclose(out2, ref2, atol=1e-4, rtol=1e-4), "tiled mismatch vs reference"

    # 3) bf16 head: native-dtype MXU path (no in-kernel f32 upcast of the tile).
    #    bf16 (or narrower) head storage is the main perf lever: the kernel is
    #    HBM-bandwidth bound, so halving itemsize halves wall time.
    head_bf16 = head.astype(jnp.bfloat16)
    out3, _ = rwkv_postprocess(x, ln_weight, ln_bias, head_bf16, state)
    out3 = jax.block_until_ready(out3)
    assert jnp.allclose(out3, ref, atol=3e-2, rtol=3e-2), "bf16 mismatch vs reference"

    print("KERNEL_OK")
</pallas_src>

<mosaic_0001>
module attributes {stable_mosaic.version = 11 : i64} {
  func.func @_postprocess_kernel(%arg0: i32, %arg1: memref<1x128xf32, #tpu.memory_space<vmem>>, %arg2: memref<1x128xf32, #tpu.memory_space<vmem>>, %arg3: memref<1x128xf32, #tpu.memory_space<vmem>>, %arg4: memref<256x128xf32, #tpu.memory_space<vmem>>, %arg5: memref<1x256xf32, #tpu.memory_space<vmem>>) attributes {dimension_semantics = [#tpu.dimension_semantics<parallel>], iteration_bounds = array<i64: 1>, scalar_prefetch = 0 : i64, scratch_operands = 0 : i64, tpu.core_type = #tpu.core_type<tc>, window_params = [{pipeline_mode = #tpu.pipeline_mode<synchronous>, transform_indices = @transform_0, window_bounds = array<i64: 1, 128>}, {pipeline_mode = #tpu.pipeline_mode<synchronous>, transform_indices = @transform_1, window_bounds = array<i64: 1, 128>}, {pipeline_mode = #tpu.pipeline_mode<synchronous>, transform_indices = @transform_2, window_bounds = array<i64: 1, 128>}, {transform_indices = @transform_3, window_bounds = array<i64: 256, 128>}, {transform_indices = @transform_4, window_bounds = array<i64: 1, 256>}]} {
    %c0 = arith.constant 0 : index
    %c0_0 = arith.constant 0 : index
    %0 = vector.load %arg1[%c0, %c0_0] : memref<1x128xf32, #tpu.memory_space<vmem>>, vector<1x128xf32>
    %cst = arith.constant dense<0.000000e+00> : vector<1xf32>
    %1 = vector.multi_reduction <add>, %0, %cst [1] : vector<1x128xf32> to vector<1xf32>
    %2 = vector.shape_cast %1 : vector<1xf32> to vector<1x1xf32>
    %cst_1 = arith.constant 1.280000e+02 : f32
    %3 = vector.broadcast %cst_1 : f32 to vector<1x1xf32>
    %4 = arith.divf %2, %3 : vector<1x1xf32>
    %5 = vector.broadcast %4 : vector<1x1xf32> to vector<1x128xf32>
    %6 = arith.subf %0, %5 : vector<1x128xf32>
    %7 = arith.mulf %6, %6 : vector<1x128xf32>
    %cst_2 = arith.constant dense<0.000000e+00> : vector<1xf32>
    %8 = vector.multi_reduction <add>, %7, %cst_2 [1] : vector<1x128xf32> to vector<1xf32>
    %9 = vector.shape_cast %8 : vector<1xf32> to vector<1x1xf32>
    %cst_3 = arith.constant 1.280000e+02 : f32
    %10 = vector.broadcast %cst_3 : f32 to vector<1x1xf32>
    %11 = arith.divf %9, %10 : vector<1x1xf32>
    %12 = vector.broadcast %4 : vector<1x1xf32> to vector<1x128xf32>
    %13 = arith.subf %0, %12 : vector<1x128xf32>
    %cst_4 = arith.constant 9.99999974E-6 : f32
    %14 = vector.broadcast %cst_4 : f32 to vector<1x1xf32>
    %15 = arith.addf %11, %14 : vector<1x1xf32>
    %16 = math.rsqrt %15 : vector<1x1xf32>
    %17 = vector.broadcast %16 : vector<1x1xf32> to vector<1x128xf32>
    %18 = arith.mulf %13, %17 : vector<1x128xf32>
    %c0_5 = arith.constant 0 : index
    %c0_6 = arith.constant 0 : index
    %19 = vector.load %arg2[%c0_5, %c0_6] : memref<1x128xf32, #tpu.memory_space<vmem>>, vector<1x128xf32>
    %20 = arith.mulf %18, %19 : vector<1x128xf32>
    %c0_7 = arith.constant 0 : index
    %c0_8 = arith.constant 0 : index
    %21 = vector.load %arg3[%c0_7, %c0_8] : memref<1x128xf32, #tpu.memory_space<vmem>>, vector<1x128xf32>
    %22 = arith.addf %20, %21 : vector<1x128xf32>
    %c0_9 = arith.constant 0 : index
    %c0_10 = arith.constant 0 : index
    %23 = vector.load %arg4[%c0_9, %c0_10] : memref<256x128xf32, #tpu.memory_space<vmem>>, vector<256x128xf32>
    %cst_11 = arith.constant dense<0.000000e+00> : vector<1x256xf32>
    %24 = tpu.matmul %22, %23, %cst_11 {dimension_numbers = #tpu.dot_dimension_numbers<[1], [1], [0], [0], [0, 0, 1, 0], [], []>} : vector<1x128xf32>, vector<256x128xf32>, vector<1x256xf32> -> vector<1x256xf32>
    %c0_12 = arith.constant 0 : index
    %c0_13 = arith.constant 0 : index
    %25 = vector.load %arg5[%c0_12, %c0_13] : memref<1x256xf32, #tpu.memory_space<vmem>>, vector<1x256xf32>
    tpu.vector_store %arg5[%c0_12, %c0_13], %24 {strides = array<i32>} : memref<1x256xf32, #tpu.memory_space<vmem>>, vector<1x256xf32>,
    return
  }
  func.func @transform_0(%arg0: i32) -> (i32, i32) {
    %c0_i32 = arith.constant 0 : i32
    %c0_i32_0 = arith.constant 0 : i32
    %c0_i32_1 = arith.constant 0 : i32
    return %c0_i32, %c0_i32_0 : i32, i32
  }
  func.func @transform_1(%arg0: i32) -> (i32, i32) {
    %c0_i32 = arith.constant 0 : i32
    %c0_i32_0 = arith.constant 0 : i32
    %c0_i32_1 = arith.constant 0 : i32
    return %c0_i32, %c0_i32_0 : i32, i32
  }
  func.func @transform_2(%arg0: i32) -> (i32, i32) {
    %c0_i32 = arith.constant 0 : i32
    %c0_i32_0 = arith.constant 0 : i32
    %c0_i32_1 = arith.constant 0 : i32
    return %c0_i32, %c0_i32_0 : i32, i32
  }
  func.func @transform_3(%arg0: i32) -> (i32, i32) {
    %c0_i32 = arith.constant 0 : i32
    %c0_i32_0 = arith.constant 0 : i32
    return %arg0, %c0_i32 : i32, i32
  }
  func.func @transform_4(%arg0: i32) -> (i32, i32) {
    %c0_i32 = arith.constant 0 : i32
    %c0_i32_0 = arith.constant 0 : i32
    return %c0_i32, %arg0 : i32, i32
  }
}

</mosaic_0001>

<bundles_post_ra>
// kernel: tpu_custom_call.1
= control target key start
LH: loop header
LB: loop body
LE: loop exit
PB: predicated region body
PF: predicated region fallthrough
CT: control target
= control target key end

     0   :  { %9 = vsyncpa [#allocation3], 0  ;;  %s434_s0 = inlined_call_operand.hbm [shape: f32[1,128], index: 0, kind: input, shape index: {}]   ;;  %s435_s1 = inlined_call_operand.vmem [shape: f32[1,128], index: 1, kind: input, shape index: {}]   ;;  %s436_s2 = inlined_call_operand.vmem [shape: f32[1,128], index: 2, kind: input, shape index: {}]   ;;  %s437_s3 = inlined_call_operand.hbm [shape: f32[256,128], index: 3, kind: input, shape index: {}]   ;;  %s438_s4 = inlined_call_operand.hbm [shape: f32[1,256], index: 4, kind: output, shape index: {}]  }
   0x1   :  { %10 = vsyncpa [#allocation6], 0 }
   0x2   :  { %11 = vsyncpa [#allocation4], 0  ;;  %s352_s15 = smov [#allocation2]   ;;  %s353_s17 = smov [#allocation5]  }
   0x3   :  { %s18_s16 = sshll.u32 %s352_s15, 4  ;;  %s31_s18 = sshll.u32 %s353_s17, 4  ;;  %s19_s16 = int_to_ptr.vmem [resolvable:$true] %s18_s16  ;;  %s383_s18 = int_to_ptr.vmem [resolvable:$true] %s31_s18 }
   0x4   :  { %s280_s21 = scalar_lea.hbm %s434_s0, 16 }
   0x5   :  { %p281_p0 = scmp.ne.s32.totalorder %s434_s0, %s280_s21  ;;  %p284_p1 = scmp.lt.u32.totalorder %s280_s21, %s434_s0 }
   0x7   :  { %p286_p2 = pnand %p284_p1, %p281_p0 }
   0x9   :  { %289 = shalt.err (!%p286_p2)
}
   0xa   :  { %s290_s26 = scalar_lea.vmem %s19_s16, 16  ;;  %s294_s27 = scalar_lea.vmem %s19_s16, 32 }
   0xb   :  { %p291_p3 = scmp.ne.s32.totalorder %s19_s16, %s290_s26  ;;  %p295_p4 = scmp.lt.s32.totalorder %s19_s16, %s19_s16 }
   0xc   :  { %p296_p5 = scmp.lt.s32.totalorder %s294_s27, %s290_s26 }
   0xe   :  { %p297_p6 = por %p296_p5, %p295_p4 }
  0x10   :  { %p298_p7 = pnand %p297_p6, %p291_p3 }
  0x12   :  { %301 = shalt.err (!%p298_p7)
}
  0x13   :  { %21 = dma.hbm_to_vmem [thread:$0]  %s434_s0, 16, %s19_s16, [#allocation3]  }
  0x14   :  { %s302_s6 = scalar_lea.hbm %s437_s3, 4096 }
  0x15   :  { %p303_p8 = scmp.ne.s32.totalorder %s437_s3, %s302_s6  ;;  %p306_p9 = scmp.lt.u32.totalorder %s302_s6, %s437_s3 }
  0x17   :  { %p308_p10 = pnand %p306_p9, %p303_p8 }
  0x19   :  { %311 = shalt.err (!%p308_p10)
}
  0x1a   :  { %s312_s11 = scalar_lea.vmem %s383_s18, 4096  ;;  %p317_p12 = scmp.lt.s32.totalorder %s383_s18, %s383_s18 }
  0x1b   :  { %p313_p11 = scmp.ne.s32.totalorder %s383_s18, %s312_s11  ;;  %p318_p13 = scmp.lt.s32.totalorder %s312_s11, %s312_s11 }
  0x1d   :  { %p319_p0 = por %p318_p13, %p317_p12 }
  0x1f   :  { %p320_p1 = pnand %p319_p0, %p313_p11 }
  0x21   :  { %323 = shalt.err (!%p320_p1)
}
  0x22   :  { %s354_s0 = smov 128   ;;  %s355_s12 = smov 8  }
  0x23   :  { %37 = dma.hbm_to_vmem [thread:$0]  %s437_s3, 4096, %s383_s18, [#allocation6], %s354_s0, %s354_s0, %s355_s12  }
  0x24   :  { %346 = dma.done.wait [#allocation3], 16  }
  0x25   :  { %347 = vsyncadd [#allocation3], 4294967280 }
  0x26   :  { %348 = dma.done.wait [#allocation6], 4096  }
  0x27   :  { %349 = vsyncadd [#allocation6], 4294963200  ;;  %vm45_vm0 = vcmask 1040384   ;;  %v44_v0 = vld [vmem:[#allocation2] sm:$0x1]  ;;  %v80_v2 = vld [vmem:[#allocation5 + $0x80] sm:$0xff] }
  0x28   :  { %v46_v1 = vsel %vm45_vm0, %v44_v0, 0.0  ;;  %v81_v3 = vld [vmem:[#allocation5 + $0x88] sm:$0xff]  ;;  %v64_v4 = vld [vmem:[#allocation5] sm:$0xff]  ;;  %v82_v7 = vld [vmem:[#allocation5 + $0x90] sm:$0xff]  ;;  %s357_s18 = smov [#allocation7]  }
  0x29   :  { %47 = vadd.xlane.f32.xlu0 %v46_v1  ;;  %v240_v5 = vpack.c.bf16 %v81_v3, %v80_v2  ;;  %v65_v6 = vld [vmem:[#allocation5 + $0x8] sm:$0xff]  ;;  %v83_v8 = vld [vmem:[#allocation5 + $0x98] sm:$0xff]  ;;  %v66_v11 = vld [vmem:[#allocation5 + $0x10] sm:$0xff]  ;;  %v173_v2 = vlaneseq }
  0x2a   :  { %v242_v9 = vpack.c.bf16 %v65_v6, %v64_v4  ;;  %v244_v10 = vpack.c.bf16 %v83_v8, %v82_v7  ;;  %v67_v12 = vld [vmem:[#allocation5 + $0x18] sm:$0xff]  ;;  %v84_v13 = vld [vmem:[#allocation5 + $0xa0] sm:$0xff]  ;;  %v85_v14 = vld [vmem:[#allocation5 + $0xa8] sm:$0xff] }
  0x2b   :  { %241 = vmatprep.subr.bf16.mxu0 %v240_v5  ;;  %v246_v15 = vpack.c.bf16 %v67_v12, %v66_v11  ;;  %v248_v16 = vpack.c.bf16 %v85_v14, %v84_v13  ;;  %v68_v17 = vld [vmem:[#allocation5 + $0x20] sm:$0xff]  ;;  %v69_v18 = vld [vmem:[#allocation5 + $0x28] sm:$0xff]  ;;  %v86_v19 = vld [vmem:[#allocation5 + $0xb0] sm:$0xff]  ;;  %v174_v4 = vshrl.u32 %v173_v2, 7  ;;  %vm187_vm1 = vcmp.lt.s32.totalorder %v173_v2, 256 }
  0x2c   :  { %243 = vmatpush3.bf16.xpose.msra.mxu0 %v242_v9  ;;  %v87_v20 = vld [vmem:[#allocation5 + $0xb8] sm:$0xff]  ;;  %v250_v21 = vpack.c.bf16 %v69_v18, %v68_v17  ;;  %v70_v23 = vld [vmem:[#allocation5 + $0x30] sm:$0xff]  ;;  %v88_v25 = vld [vmem:[#allocation5 + $0xc0] sm:$0xff] }
  0x2d   :  { %245 = vmatprep.subr.bf16.mxu0 %v244_v10  ;;  %v252_v22 = vpack.c.bf16 %v87_v20, %v86_v19  ;;  %v71_v24 = vld [vmem:[#allocation5 + $0x38] sm:$0xff]  ;;  %v89_v26 = vld [vmem:[#allocation5 + $0xc8] sm:$0xff]  ;;  %v72_v29 = vld [vmem:[#allocation5 + $0x40] sm:$0xff] }
  0x2e   :  { %v254_v27 = vpack.c.bf16 %v71_v24, %v70_v23  ;;  %v256_v28 = vpack.c.bf16 %v89_v26, %v88_v25  ;;  %v73_v30 = vld [vmem:[#allocation5 + $0x48] sm:$0xff]  ;;  %v90_v31 = vld [vmem:[#allocation5 + $0xd0] sm:$0xff]  ;;  %v91_v32 = vld [vmem:[#allocation5 + $0xd8] sm:$0xff] }
  0x2f   :  { %v258_v33 = vpack.c.bf16 %v73_v30, %v72_v29  ;;  %v260_v34 = vpack.c.bf16 %v91_v32, %v90_v31  ;;  %v74_v35 = vld [vmem:[#allocation5 + $0x50] sm:$0xff]  ;;  %v75_v36 = vld [vmem:[#allocation5 + $0x58] sm:$0xff]  ;;  %v92_v43 = vld [vmem:[#allocation5 + $0xe0] sm:$0xff] }
  0x30   :  { %v262_v37 = vpack.c.bf16 %v75_v36, %v74_v35  ;;  %v93_v44 = vld [vmem:[#allocation5 + $0xe8] sm:$0xff]  ;;  %v76_v46 = vld [vmem:[#allocation5 + $0x60] sm:$0xff]  ;;  %v94_v48 = vld [vmem:[#allocation5 + $0xf0] sm:$0xff] }
  0x31   :  { %v264_v45 = vpack.c.bf16 %v93_v44, %v92_v43  ;;  %v77_v47 = vld [vmem:[#allocation5 + $0x68] sm:$0xff]  ;;  %v95_v50 = vld [vmem:[#allocation5 + $0xf8] sm:$0xff]  ;;  %v78_v52 = vld [vmem:[#allocation5 + $0x70] sm:$0xff] }
  0x32   :  { %v266_v49 = vpack.c.bf16 %v77_v47, %v76_v46  ;;  %v268_v51 = vpack.c.bf16 %v95_v50, %v94_v48  ;;  %v79_v53 = vld [vmem:[#allocation5 + $0x78] sm:$0xff] }
  0x33   :  { %v270_v54 = vpack.c.bf16 %v79_v53, %v78_v52  ;;  %v60_v59 = vld [vmem:[%s435_s1] sm:$0x1]  ;;  %s196_s1 = sshll.u32 %s357_s18, 4  ;;  %s197_s1 = int_to_ptr.vmem [resolvable:$true] %s196_s1 }
  0x34   :  { %247 = vmatpush3.bf16.xpose.msra.mxu0 %v246_v15  ;;  %v62_v61 = vld [vmem:[%s436_s2] sm:$0x1]  ;;  %s324_s2 = scalar_lea.vmem %s197_s1, 32  ;;  %p329_p3 = scmp.lt.s32.totalorder %s197_s1, %s197_s1 }
  0x35   :  { %249 = vmatprep.subr.bf16.mxu0 %v248_v16  ;;  %p325_p2 = scmp.ne.s32.totalorder %s197_s1, %s324_s2  ;;  %p330_p4 = scmp.lt.s32.totalorder %s324_s2, %s324_s2 }
  0x37   :  { %p331_p5 = por %p330_p4, %p329_p3 }
  0x39   :  { %p332_p6 = pnand %p331_p5, %p325_p2 }
  0x3c   :  { %251 = vmatpush3.bf16.xpose.msra.mxu0 %v250_v21 }
  0x3d   :  { %253 = vmatprep.subr.bf16.mxu0 %v252_v22 }
  0x44   :  { %255 = vmatpush3.bf16.xpose.msra.mxu0 %v254_v27 }
  0x45   :  { %257 = vmatprep.subr.bf16.mxu0 %v256_v28 }
  0x4c   :  { %259 = vmatpush3.bf16.xpose.msra.mxu0 %v258_v33 }
  0x4d   :  { %261 = vmatprep.subr.bf16.mxu0 %v260_v34 }
  0x54   :  { %263 = vmatpush3.bf16.xpose.msra.mxu0 %v262_v37 }
  0x55   :  { %265 = vmatprep.subr.bf16.mxu0 %v264_v45 }
  0x5c   :  { %267 = vmatpush3.bf16.xpose.msra.mxu0 %v266_v49 }
  0x5d   :  { %269 = vmatprep.subr.bf16.mxu0 %v268_v51 }
  0x64   :  { %271 = vmatpush3.bf16.xpose.msra.mxu0 %v270_v54 }
  0xb6   :  { %v48_v38 = vpop.xlane.xlu0 %47 }
  0xb7   :  { %v50_v39 = vmul.f32 0.0078125, %v48_v38 }
  0xb9   :  { %v51_v40 = vsub.f32 %v44_v0, %v50_v39  ;;  %v356_v0 = vmov 1966171168  }
  0xba   :  { %v171_v1 = vunpack.c.l.s4 %v356_v0 }
  0xbb   :  { %v52_v41 = vmul.f32 %v51_v40, %v51_v40 }
  0xbc   :  { %v172_v3 = vunpack.c.0.s8 %v171_v1 }
  0xbd   :  { %v53_v42 = vsel %vm45_vm0, %v52_v41, 0.0 }
  0xbe   :  { %54 = vadd.xlane.f32.xlu0 %v53_v42  ;;  %v175_v6 = vsub.s32 %v172_v3, %v174_v4 }
 0x14b   :  { %v55_v55 = vpop.xlane.xlu0 %54 }
 0x14c   :  { %v56_v56 = vmul.f32 0.0078125, %v55_v55 }
 0x14e   :  { %v57_v57 = vadd.f32 1e-05, %v56_v56 }
 0x150   :  { %278 = vrsqrt.f32 %v57_v57 }
 0x15a   :  { %v279_v58 = vpop.eup %278 }
 0x15b   :  { %v59_v60 = vmul.f32 %v279_v58, %v51_v40 }
 0x15d   :  { %v61_v62 = vmul.f32 %v60_v59, %v59_v60 }
 0x15f   :  { %v63_v63 = vadd.f32 %v62_v61, %v61_v62 }
 0x161   :  { %238 = vmatprep.mubr.f32.mxu0 %v63_v63 }
 0x162   :  { %239 = vmatmul.mubr.f32.vlgmr.msra.gmra.mrb[0].mxu0 %v63_v63 }
 0x235   :  { %v162_v5 = vpop.f32.mrb[0].mxu0 }
 0x236   :  { %v164_v7 = vpop.f32.mrb[1].mxu0 }
 0x237   :  { %v169_v8 = vcombine.low %v162_v5, %v164_v7 }
 0x239   :  { %v176_v9 = vrot.slane %v169_v8, %v175_v6 }
 0x23b   :  { %v183_v10 = vrot.slane %v176_v9, %v175_v6 }
 0x23d   :  { %189 = vst.msk [vmem:[#allocation7] sm:$0x3] %vm187_vm1, %v183_v10 }
 0x23e   :  { %335 = shalt.err (!%p332_p6)
}
 0x23f   :  { %s336_s21 = scalar_lea.hbm %s438_s4, 32 }
 0x240   :  { %p337_p7 = scmp.ne.s32.totalorder %s438_s4, %s336_s21  ;;  %p340_p8 = scmp.lt.u32.totalorder %s336_s21, %s438_s4 }
 0x242   :  { %p342_p9 = pnand %p340_p8, %p337_p7 }
 0x244   :  { %345 = shalt.err (!%p342_p9)
}
 0x245   :  { %199 = dma.vmem_to_hbm [thread:$0]  %s197_s1, 32, %s438_s4, [#allocation4]  }
 0x246   :  { %350 = dma.done.wait [#allocation4], 32  }
 0x247   :  { %351 = vsyncadd [#allocation4], 4294967264 }
 0x248   :  { %203 = vsyncpa [#allocation3], 1 }
 0x249   :  { %204 = vsyncpa [#allocation6], 1 }
 0x24a   :  { %205 = vsyncpa [#allocation4], 1 }

</bundles_post_ra>
